<compile_context>
chip_gen: v5e
topology: v5e:2x2
jax: 0.10.0
libtpu: 0.0.40
codegen_flags: <defaults>
</compile_context>

<pallas_src>
import functools
import math

import jax
import jax.numpy as jnp
from jax.experimental import pallas as pl
from jax.experimental.pallas import tpu as pltpu

VOCAB = 50
LANG_DIM = 768
# Worst-case per-call working set of the kernels below is ~15 MiB (resident
# double-buffered 9*1024 x 256 bf16 conv weight slab + row buffers), so 48 MiB
# is safe on v7x's 64 MiB VMEM and leaves ample headroom on v5e/v6e (128 MiB).
VMEM_LIMIT = 48 * 1024 * 1024


# ---------------------------------------------------------------------------
# small helpers
# ---------------------------------------------------------------------------
def _round_up(n, m):
    return ((n + m - 1) // m) * m


def _pad_axis(x, axis, new_size):
    if x.shape[axis] == new_size:
        return x
    pads = [(0, 0)] * x.ndim
    pads[axis] = (0, new_size - x.shape[axis])
    return jnp.pad(x, pads)


def _bn_fold(bn, eps=1e-5):
    s = bn["gamma"] / jnp.sqrt(bn["var"] + eps)
    return s, bn["beta"] - bn["mean"] * s


# ---------------------------------------------------------------------------
# Pallas kernels
# ---------------------------------------------------------------------------
def _mm_single_k_kernel(x_ref, w_ref, s_ref, b_ref, o_ref, *, relu):
    """Single-K-block matmul: dot -> scale/bias(+ReLU) -> store. No scratch."""
    r = jnp.dot(x_ref[...], w_ref[...], preferred_element_type=jnp.float32)
    r = r * s_ref[...] + b_ref[...]
    if relu:
        r = jnp.maximum(r, 0.0)
    o_ref[...] = r.astype(o_ref.dtype)


def _mm_multi_k_kernel(x_ref, w_ref, s_ref, b_ref, o_ref, acc_ref, *, relu):
    """Tiled (tm,tn,tk) matmul, bf16 in / f32 acc, fused col scale/bias(+ReLU)."""
    @pl.when(pl.program_id(2) == 0)
    def _():
        acc_ref[...] = jnp.zeros_like(acc_ref)

    acc_ref[...] += jnp.dot(x_ref[...], w_ref[...],
                            preferred_element_type=jnp.float32)

    @pl.when(pl.program_id(2) == pl.num_programs(2) - 1)
    def _():
        r = acc_ref[...] * s_ref[...] + b_ref[...]
        if relu:
            r = jnp.maximum(r, 0.0)
        o_ref[...] = r.astype(o_ref.dtype)


def _conv3x3_kernel(x0_ref, x1_ref, x2_ref, w_ref, s_ref, b_ref, o_ref, *, relu):
    """Direct 3x3 conv, one output row (all batches) x one Cout tile per step.

    grid = (cout tile j [outer], output row y [inner]).  x{t}_ref is the padded
    input row y + t (t = dy tap): shape (B, W+2, Cp).  All nine (dy, dx) taps
    are concatenated along the channel (lane) dim into one (W, 9*Cp) LHS per
    batch and contracted with the resident (9*Cp, tn) weight slab in a single
    MXU matmul - no f32 scratch accumulator.
    """
    B, Wp, Cp = x0_ref.shape
    W = Wp - 2

    for b in range(B):
        taps = []
        for x_ref in (x0_ref, x1_ref, x2_ref):            # dy = 0, 1, 2
            xr = x_ref[b]                                  # (Wp, Cp) bf16
            for dx in range(3):
                taps.append(xr[dx:dx + W, :])              # (W, Cp)
        lhs = jnp.concatenate(taps, axis=-1)               # (W, 9*Cp)
        r = jnp.dot(lhs, w_ref[...], preferred_element_type=jnp.float32)
        r = r * s_ref[...] + b_ref[...]                    # (W, tn)
        if relu:
            r = jnp.maximum(r, 0.0)
        o_ref[b] = r.astype(o_ref.dtype)


def _lang_attn_kernel(vt_ref, lang_ref, wq_ref, bq_ref, wkv_ref, bkv_ref,
                      wo_ref, bo_ref, o_ref, kv_ref, *, scale, n_keys):
    """Fused LangCrossAtt for one (batch, query-tile) grid step.

    K/V are projected ONCE per batch (q-tile index 0) into the persistent
    kv_ref scratch, then every query tile does: Q projection, lane-dense
    masked softmax, P.V, out_proj and the `vision * attention` gating.
    """
    Sp, D = lang_ref.shape

    @pl.when(pl.program_id(1) == 0)
    def _():
        lg = lang_ref[...]                                            # (Sp, D)
        k = (jnp.dot(lg, wkv_ref[0], preferred_element_type=jnp.float32)
             + bkv_ref[0])
        v = (jnp.dot(lg, wkv_ref[1], preferred_element_type=jnp.float32)
             + bkv_ref[1])
        kv_ref[0] = k.astype(jnp.bfloat16)
        kv_ref[1] = v.astype(jnp.bfloat16)

    vt = vt_ref[...]                                                  # (tq, D)
    q = (jnp.dot(vt, wq_ref[...], preferred_element_type=jnp.float32)
         + bq_ref[...])

    s = jax.lax.dot_general(q.astype(jnp.bfloat16), kv_ref[0],
                            (((1,), (1,)), ((), ())),
                            preferred_element_type=jnp.float32) * scale
    key_ok = jax.lax.broadcasted_iota(jnp.int32, (1, Sp), 1) < n_keys
    s = jnp.where(key_ok, s, -1e30)                                   # mask pad
    m = jnp.max(s, axis=-1, keepdims=True)
    p = jnp.exp(s - m)
    p = p * pl.reciprocal(jnp.sum(p, axis=-1, keepdims=True), approx=True)

    att = jnp.dot(p.astype(jnp.bfloat16), kv_ref[1],
                  preferred_element_type=jnp.float32)                 # (tq, D)
    att = (jnp.dot(att.astype(jnp.bfloat16), wo_ref[...],
                   preferred_element_type=jnp.float32) + bo_ref[...])
    o_ref[...] = (att * vt.astype(jnp.float32)).astype(o_ref.dtype)


# ---------------------------------------------------------------------------
# Pallas wrappers
# ---------------------------------------------------------------------------
def pallas_matmul(x, w, scale=None, bias=None, relu=False,
                  out_dtype=jnp.float32):
    """y = act((x @ w) * scale + bias).  x:(M,K) w:(K,N) scale/bias:(N,)."""
    M, K = x.shape
    N = w.shape[1]
    if scale is None:
        scale = jnp.ones((N,), jnp.float32)
    if bias is None:
        bias = jnp.zeros((N,), jnp.float32)

    x = x.astype(jnp.bfloat16)
    w = w.astype(jnp.bfloat16)

    # tiles: lane-dense N, bf16-packed M, adaptive K (single block when small).
    tn = 128 if N <= 128 else 256
    tm = 512 if M >= 512 else _round_up(M, 16)
    tk = _round_up(K, 16) if K <= 1024 else 512
    Mp, Kp, Np = _round_up(M, tm), _round_up(K, tk), _round_up(N, tn)
    nm, nj, nk = Mp // tm, Np // tn, Kp // tk

    xp = _pad_axis(_pad_axis(x, 0, Mp), 1, Kp)
    wp = _pad_axis(_pad_axis(w, 0, Kp), 1, Np)
    sp = _pad_axis(scale.reshape(1, N).astype(jnp.float32), 1, Np)
    bp = _pad_axis(bias.reshape(1, N).astype(jnp.float32), 1, Np)

    if nk == 1:
        out = pl.pallas_call(
            functools.partial(_mm_single_k_kernel, relu=relu),
            out_shape=jax.ShapeDtypeStruct((Mp, Np), out_dtype),
            grid_spec=pltpu.PrefetchScalarGridSpec(
                num_scalar_prefetch=0,
                grid=(nm, nj),
                in_specs=[
                    pl.BlockSpec((tm, Kp), lambda i, j: (i, 0)),
                    pl.BlockSpec((Kp, tn), lambda i, j: (0, j)),
                    pl.BlockSpec((1, tn), lambda i, j: (0, j)),
                    pl.BlockSpec((1, tn), lambda i, j: (0, j)),
                ],
                out_specs=pl.BlockSpec((tm, tn), lambda i, j: (i, j)),
            ),
            compiler_params=pltpu.CompilerParams(
                dimension_semantics=("parallel", "parallel"),
                vmem_limit_bytes=VMEM_LIMIT),
        )(xp, wp, sp, bp)
    else:
        out = pl.pallas_call(
            functools.partial(_mm_multi_k_kernel, relu=relu),
            out_shape=jax.ShapeDtypeStruct((Mp, Np), out_dtype),
            grid_spec=pltpu.PrefetchScalarGridSpec(
                num_scalar_prefetch=0,
                grid=(nm, nj, nk),
                in_specs=[
                    pl.BlockSpec((tm, tk), lambda i, j, k: (i, k)),
                    pl.BlockSpec((tk, tn), lambda i, j, k: (k, j)),
                    pl.BlockSpec((1, tn), lambda i, j, k: (0, j)),
                    pl.BlockSpec((1, tn), lambda i, j, k: (0, j)),
                ],
                out_specs=pl.BlockSpec((tm, tn), lambda i, j, k: (i, j)),
                scratch_shapes=[pltpu.VMEM((tm, tn), jnp.float32)],
            ),
            compiler_params=pltpu.CompilerParams(
                dimension_semantics=("parallel", "parallel", "arbitrary"),
                vmem_limit_bytes=VMEM_LIMIT),
        )(xp, wp, sp, bp)
    return out[:M, :N]


def conv3x3_bn_relu(x, w, bn, out_dtype=jnp.bfloat16):
    """x: (B,H,W,Cin) NHWC ; w: torch layout (Cout,Cin,3,3); stride 1, pad 1."""
    B, H, W, C = x.shape
    Cout = w.shape[0]
    scale, bias = _bn_fold(bn)

    Cp = _round_up(C, 16)                           # bf16 sublane-packed K taps
    xbf = _pad_axis(x.astype(jnp.bfloat16), 3, Cp)
    xp = jnp.pad(xbf, ((0, 0), (1, 1), (1, 1), (0, 0)))  # spatial halo (only copy)
    Wp = W + 2

    # weight rows ordered (ky, kx, c) to match the in-kernel tap concatenation.
    wpad = _pad_axis(w, 1, Cp)                                   # (Cout,Cp,3,3)
    wk = jnp.transpose(wpad, (2, 3, 1, 0)).reshape(9 * Cp, Cout)

    tn = 128 if Cout <= 128 else 256
    Np = _round_up(Cout, tn)
    wk = _pad_axis(wk, 1, Np).astype(jnp.bfloat16)
    sp = _pad_axis(scale.reshape(1, Cout).astype(jnp.float32), 1, Np)
    bp = _pad_axis(bias.reshape(1, Cout).astype(jnp.float32), 1, Np)
    nj = Np // tn

    # Three row-views of the SAME padded array give the dy = 0/1/2 taps; row
    # block of size 1 -> block index == element row, so y + t is the shifted row.
    x_specs = [
        pl.BlockSpec((B, None, Wp, Cp), lambda j, y, t=t: (0, y + t, 0, 0))
        for t in range(3)
    ]

    out = pl.pallas_call(
        functools.partial(_conv3x3_kernel, relu=True),
        out_shape=jax.ShapeDtypeStruct((B, H, W, Np), out_dtype),
        grid_spec=pltpu.PrefetchScalarGridSpec(
            num_scalar_prefetch=0,
            # cout-tile axis OUTER, row axis INNER -> the weight slab's block
            # index is constant across the row sweep and stays VMEM-resident.
            grid=(nj, H),
            in_specs=x_specs + [
                pl.BlockSpec((9 * Cp, tn), lambda j, y: (0, j)),
                pl.BlockSpec((1, tn), lambda j, y: (0, j)),
                pl.BlockSpec((1, tn), lambda j, y: (0, j)),
            ],
            out_specs=pl.BlockSpec((B, None, W, tn), lambda j, y: (0, y, 0, j)),
        ),
        compiler_params=pltpu.CompilerParams(
            dimension_semantics=("parallel", "parallel"),
            vmem_limit_bytes=VMEM_LIMIT),
    )(xp, xp, xp, wk, sp, bp)
    return out[..., :Cout]


# ---------------------------------------------------------------------------
# Layer building blocks (glue in JAX, compute in Pallas)
# ---------------------------------------------------------------------------
def double_conv(x, p):
    x = conv3x3_bn_relu(x, p["w1"], p["bn1"])
    x = conv3x3_bn_relu(x, p["w2"], p["bn2"])
    return x


def maxpool2(x):
    B, H, W, C = x.shape
    return x.reshape(B, H // 2, 2, W // 2, 2, C).max(axis=(2, 4))


def conv_transpose2x2(x, p):
    """ConvTranspose2d(kernel=2, stride=2); torch weight layout (Cin,Cout,2,2)."""
    B, H, W, C = x.shape
    Cout = p["w"].shape[1]
    # columns ordered (kh, kw, Cout) so Cout stays the last (lane) dim through
    # the spatial interleave below (cheap sublane interleave, no lane relayout).
    wm = jnp.transpose(p["w"], (0, 2, 3, 1)).reshape(C, 4 * Cout)
    bm = jnp.tile(p["b"], 4)
    y = pallas_matmul(x.reshape(B * H * W, C), wm, bias=bm,
                      out_dtype=jnp.bfloat16)
    y = y.reshape(B, H, W, 2, 2, Cout).transpose(0, 1, 3, 2, 4, 5)
    return y.reshape(B, 2 * H, 2 * W, Cout)


def conv1x1(x, w, b, out_dtype=jnp.float32):
    B, H, W, C = x.shape
    Cout = w.shape[0]
    wm = w.reshape(Cout, C).T
    y = pallas_matmul(x.reshape(B * H * W, C), wm, bias=b, out_dtype=out_dtype)
    return y.reshape(B, H, W, Cout)


def linear(x, p):
    """x: (B,S,Din); torch Linear weight (Dout,Din)."""
    B, S, Din = x.shape
    Dout = p["w"].shape[0]
    y = pallas_matmul(x.reshape(B * S, Din), p["w"].T, bias=p["b"],
                      out_dtype=jnp.bfloat16)
    return y.reshape(B, S, Dout)


def lang_cross_att(lang_rep, vision_rep, p):
    # TODO(synk): LangCrossAtt is not defined in the provided snippet; implemented
    # per the original ConTEXTual repo: single-head nn.MultiheadAttention with
    # vision tokens as queries, language as key/value, then elementwise gating.
    B, H, W, D = vision_rep.shape
    S = lang_rep.shape[1]
    Lq = H * W

    vt = vision_rep.reshape(B, Lq, D).astype(jnp.bfloat16)
    SP = _round_up(max(S, 8), 128)                          # lane-dense keys
    lang = _pad_axis(lang_rep.astype(jnp.bfloat16), 1, SP)  # (B, SP, D)

    in_w, in_b = p["in_w"], p["in_b"]
    wq = in_w[:D].T.astype(jnp.bfloat16)                               # (D, D)
    bq = in_b[:D].reshape(1, D).astype(jnp.float32)
    wkv = jnp.stack([in_w[D:2 * D].T, in_w[2 * D:].T]).astype(jnp.bfloat16)   # (2,D,D)
    bkv = jnp.stack([in_b[D:2 * D], in_b[2 * D:]]).reshape(2, 1, D).astype(jnp.float32)
    wo = p["out_w"].T.astype(jnp.bfloat16)
    bo = p["out_b"].reshape(1, D).astype(jnp.float32)

    tq = Lq if Lq <= 256 else 256
    Lqp = _round_up(Lq, tq)
    vtp = _pad_axis(vt, 1, Lqp)
    nq = Lqp // tq

    out = pl.pallas_call(
        functools.partial(_lang_attn_kernel, scale=1.0 / math.sqrt(D), n_keys=S),
        out_shape=jax.ShapeDtypeStruct((B, Lqp, D), jnp.bfloat16),
        grid_spec=pltpu.PrefetchScalarGridSpec(
            num_scalar_prefetch=0,
            grid=(B, nq),   # batch "parallel" (megacore), q-tiles inner
            in_specs=[
                pl.BlockSpec((None, tq, D), lambda b, i: (b, i, 0)),
                pl.BlockSpec((None, SP, D), lambda b, i: (b, 0, 0)),
                pl.BlockSpec((D, D), lambda b, i: (0, 0)),
                pl.BlockSpec((1, D), lambda b, i: (0, 0)),
                pl.BlockSpec((2, D, D), lambda b, i: (0, 0, 0)),
                pl.BlockSpec((2, 1, D), lambda b, i: (0, 0, 0)),
                pl.BlockSpec((D, D), lambda b, i: (0, 0)),
                pl.BlockSpec((1, D), lambda b, i: (0, 0)),
            ],
            out_specs=pl.BlockSpec((None, tq, D), lambda b, i: (b, i, 0)),
            scratch_shapes=[pltpu.VMEM((2, SP, D), jnp.bfloat16)],  # K/V per batch
        ),
        compiler_params=pltpu.CompilerParams(
            dimension_semantics=("parallel", "arbitrary"),
            vmem_limit_bytes=VMEM_LIMIT),
    )(vtp, lang, wq, bq, wkv, bkv, wo, bo)
    return out[:, :Lq, :].reshape(B, H, W, D)


def concatenate_layers(x1, x2):
    dY = x2.shape[1] - x1.shape[1]
    dX = x2.shape[2] - x1.shape[2]
    x1 = jnp.pad(x1, ((0, 0), (dY // 2, dY - dY // 2),
                      (dX // 2, dX - dX // 2), (0, 0)))
    return jnp.concatenate([x2, x1], axis=-1)


def lang_encode(p, ids, mask, token_type_ids):
    # Synthetic deterministic stand-in for the external `lang_model` ctor arg.
    word = p["tok_emb"][ids] + p["type_emb"][token_type_ids]
    word = word * mask[..., None].astype(jnp.float32)
    report = word.mean(axis=1)
    return word, report


# ---------------------------------------------------------------------------
# Parameters
# ---------------------------------------------------------------------------
def init_params(key, n_channels, n_classes):
    keys = iter(jax.random.split(key, 80))

    def nrm(shape, std=0.02):
        return jax.random.normal(next(keys), shape, jnp.float32) * std

    def bn(c):
        return dict(gamma=jnp.ones((c,), jnp.float32), beta=jnp.zeros((c,), jnp.float32),
                    mean=jnp.zeros((c,), jnp.float32), var=jnp.ones((c,), jnp.float32))

    def dconv(cin, cout):
        return dict(w1=nrm((cout, cin, 3, 3)), bn1=bn(cout),
                    w2=nrm((cout, cout, 3, 3)), bn2=bn(cout))

    def convT(cin, cout):
        return dict(w=nrm((cin, cout, 2, 2)), b=jnp.zeros((cout,), jnp.float32))

    def lin(din, dout):
        return dict(w=nrm((dout, din)), b=jnp.zeros((dout,), jnp.float32))

    def mha(d):
        return dict(in_w=nrm((3 * d, d)), in_b=jnp.zeros((3 * d,), jnp.float32),
                    out_w=nrm((d, d)), out_b=jnp.zeros((d,), jnp.float32))

    return dict(
        inc=dconv(n_channels, 64),
        down1=dconv(64, 128), down2=dconv(128, 256),
        down3=dconv(256, 512), down4=dconv(512, 1024),
        up1=convT(1024, 512), up2=convT(512, 256),
        up3=convT(256, 128), up4=convT(128, 64),
        up_conv1=dconv(1024, 512), up_conv2=dconv(512, 256),
        up_conv3=dconv(256, 128), up_conv4=dconv(128, 64),
        outc=dict(w=nrm((n_classes, 64, 1, 1)), b=jnp.zeros((n_classes,), jnp.float32)),
        lang_proj1=lin(LANG_DIM, 512), lang_proj2=lin(LANG_DIM, 256),
        lang_proj3=lin(LANG_DIM, 128), lang_proj4=lin(LANG_DIM, 64),
        lang_attn1=mha(512), lang_attn2=mha(256),
        lang_attn3=mha(128), lang_attn4=mha(64),
        lang=dict(tok_emb=nrm((VOCAB, LANG_DIM)), type_emb=nrm((2, LANG_DIM))),
    )


# ---------------------------------------------------------------------------
# Forward pass (mirrors Attention_ConTEXTual_Lang_Seg_Model.forward)
# ---------------------------------------------------------------------------
def forward(params, img_nchw, ids, mask, token_type_ids):
    word_rep, report_rep = lang_encode(params["lang"], ids, mask, token_type_ids)
    lang_rep = word_rep                                   # (B, S, 768)

    x = jnp.transpose(img_nchw, (0, 2, 3, 1))             # NCHW -> NHWC

    x1 = double_conv(x, params["inc"])
    x2 = double_conv(maxpool2(x1), params["down1"])
    x3 = double_conv(maxpool2(x2), params["down2"])
    x4 = double_conv(maxpool2(x3), params["down3"])
    x5 = double_conv(maxpool2(x4), params["down4"])

    d1 = conv_transpose2x2(x5, params["up1"])
    l1 = linear(lang_rep, params["lang_proj1"])
    d1 = lang_cross_att(l1, d1, params["lang_attn1"])
    x = double_conv(concatenate_layers(d1, x4), params["up_conv1"])

    d2 = conv_transpose2x2(x, params["up2"])
    l2 = linear(lang_rep, params["lang_proj2"])
    d2 = lang_cross_att(l2, d2, params["lang_attn2"])
    x = double_conv(concatenate_layers(d2, x3), params["up_conv2"])

    d3 = conv_transpose2x2(x, params["up3"])
    l3 = linear(lang_rep, params["lang_proj3"])
    d3 = lang_cross_att(l3, d3, params["lang_attn3"])
    x = double_conv(concatenate_layers(d3, x2), params["up_conv3"])

    d4 = conv_transpose2x2(x, params["up4"])
    l4 = linear(lang_rep, params["lang_proj4"])
    d4 = lang_cross_att(l4, d4, params["lang_attn4"])
    x = double_conv(concatenate_layers(d4, x1), params["up_conv4"])

    logits = conv1x1(x, params["outc"]["w"], params["outc"]["b"])
    return jnp.transpose(logits, (0, 3, 1, 2))            # NHWC -> NCHW


# ---------------------------------------------------------------------------
if __name__ == "__main__":
    key = jax.random.PRNGKey(0)
    kp, ki, kid = jax.random.split(key, 3)

    n_channels, n_classes = 3, 1
    B, H, W, S = 2, 16, 16, 8

    params = init_params(kp, n_channels, n_classes)
    img = jax.random.normal(ki, (B, n_channels, H, W), jnp.float32)
    ids = jax.random.randint(kid, (B, S), 0, VOCAB)
    mask = jnp.ones((B, S), jnp.int32)
    token_type_ids = jnp.zeros((B, S), jnp.int32)

    logits = forward(params, img, ids, mask, token_type_ids)
    logits = jax.block_until_ready(logits)

    assert logits.shape == (B, n_classes, H, W), logits.shape
    assert bool(jnp.all(jnp.isfinite(logits)))
    print("KERNEL_OK")
</pallas_src>

<mosaic_0001>
module attributes {stable_mosaic.version = 11 : i64} {
  func.func @_conv3x3_kernel(%arg0: i32, %arg1: i32, %arg2: memref<2x1x18x16xbf16, #tpu.memory_space<vmem>>, %arg3: memref<2x1x18x16xbf16, #tpu.memory_space<vmem>>, %arg4: memref<2x1x18x16xbf16, #tpu.memory_space<vmem>>, %arg5: memref<144x128xbf16, #tpu.memory_space<vmem>>, %arg6: memref<1x128xf32, #tpu.memory_space<vmem>>, %arg7: memref<1x128xf32, #tpu.memory_space<vmem>>, %arg8: memref<2x1x16x128xbf16, #tpu.memory_space<vmem>>) attributes {dimension_semantics = [#tpu.dimension_semantics<parallel>, #tpu.dimension_semantics<parallel>], iteration_bounds = array<i64: 1, 16>, scalar_prefetch = 0 : i64, scratch_operands = 0 : i64, tpu.core_type = #tpu.core_type<tc>, window_params = [{transform_indices = @transform_0, window_bounds = array<i64: 2, 1, 18, 16>}, {transform_indices = @transform_1, window_bounds = array<i64: 2, 1, 18, 16>}, {transform_indices = @transform_2, window_bounds = array<i64: 2, 1, 18, 16>}, {transform_indices = @transform_3, window_bounds = array<i64: 144, 128>}, {transform_indices = @transform_4, window_bounds = array<i64: 1, 128>}, {transform_indices = @transform_5, window_bounds = array<i64: 1, 128>}, {transform_indices = @transform_6, window_bounds = array<i64: 2, 1, 16, 128>}]} {
    %c0 = arith.constant 0 : index
    %c0_0 = arith.constant 0 : index
    %c0_1 = arith.constant 0 : index
    %c0_2 = arith.constant 0 : index
    %0 = vector.load %arg2[%c0, %c0_0, %c0_1, %c0_2] : memref<2x1x18x16xbf16, #tpu.memory_space<vmem>>, vector<1x1x18x16xbf16>
    %1 = vector.shape_cast %0 : vector<1x1x18x16xbf16> to vector<18x16xbf16>
    %2 = vector.extract_strided_slice %1 {offsets = [0, 0], sizes = [16, 16], strides = [1, 1]} : vector<18x16xbf16> to vector<16x16xbf16>
    %3 = vector.extract_strided_slice %1 {offsets = [1, 0], sizes = [16, 16], strides = [1, 1]} : vector<18x16xbf16> to vector<16x16xbf16>
    %4 = vector.extract_strided_slice %1 {offsets = [2, 0], sizes = [16, 16], strides = [1, 1]} : vector<18x16xbf16> to vector<16x16xbf16>
    %c0_3 = arith.constant 0 : index
    %c0_4 = arith.constant 0 : index
    %c0_5 = arith.constant 0 : index
    %c0_6 = arith.constant 0 : index
    %5 = vector.load %arg3[%c0_3, %c0_4, %c0_5, %c0_6] : memref<2x1x18x16xbf16, #tpu.memory_space<vmem>>, vector<1x1x18x16xbf16>
    %6 = vector.shape_cast %5 : vector<1x1x18x16xbf16> to vector<18x16xbf16>
    %7 = vector.extract_strided_slice %6 {offsets = [0, 0], sizes = [16, 16], strides = [1, 1]} : vector<18x16xbf16> to vector<16x16xbf16>
    %8 = vector.extract_strided_slice %6 {offsets = [1, 0], sizes = [16, 16], strides = [1, 1]} : vector<18x16xbf16> to vector<16x16xbf16>
    %9 = vector.extract_strided_slice %6 {offsets = [2, 0], sizes = [16, 16], strides = [1, 1]} : vector<18x16xbf16> to vector<16x16xbf16>
    %c0_7 = arith.constant 0 : index
    %c0_8 = arith.constant 0 : index
    %c0_9 = arith.constant 0 : index
    %c0_10 = arith.constant 0 : index
    %10 = vector.load %arg4[%c0_7, %c0_8, %c0_9, %c0_10] : memref<2x1x18x16xbf16, #tpu.memory_space<vmem>>, vector<1x1x18x16xbf16>
    %11 = vector.shape_cast %10 : vector<1x1x18x16xbf16> to vector<18x16xbf16>
    %12 = vector.extract_strided_slice %11 {offsets = [0, 0], sizes = [16, 16], strides = [1, 1]} : vector<18x16xbf16> to vector<16x16xbf16>
    %13 = vector.extract_strided_slice %11 {offsets = [1, 0], sizes = [16, 16], strides = [1, 1]} : vector<18x16xbf16> to vector<16x16xbf16>
    %14 = vector.extract_strided_slice %11 {offsets = [2, 0], sizes = [16, 16], strides = [1, 1]} : vector<18x16xbf16> to vector<16x16xbf16>
    %15 = tpu.concatenate %2, %3, %4, %7, %8, %9, %12, %13, %14 in 1 : vector<16x16xbf16>, vector<16x16xbf16>, vector<16x16xbf16>, vector<16x16xbf16>, vector<16x16xbf16>, vector<16x16xbf16>, vector<16x16xbf16>, vector<16x16xbf16>, vector<16x16xbf16> -> vector<16x144xbf16>
    %c0_11 = arith.constant 0 : index
    %c0_12 = arith.constant 0 : index
    %16 = vector.load %arg5[%c0_11, %c0_12] : memref<144x128xbf16, #tpu.memory_space<vmem>>, vector<144x128xbf16>
    %cst = arith.constant dense<0.000000e+00> : vector<16x128xf32>
    %17 = tpu.matmul %15, %16, %cst {dimension_numbers = #tpu.dot_dimension_numbers<[1], [0], [0], [1], [0, 0, 1, 1], [], []>} : vector<16x144xbf16>, vector<144x128xbf16>, vector<16x128xf32> -> vector<16x128xf32>
    %c0_13 = arith.constant 0 : index
    %c0_14 = arith.constant 0 : index
    %18 = vector.load %arg6[%c0_13, %c0_14] : memref<1x128xf32, #tpu.memory_space<vmem>>, vector<1x128xf32>
    %19 = vector.broadcast %18 : vector<1x128xf32> to vector<16x128xf32>
    %20 = arith.mulf %17, %19 : vector<16x128xf32>
    %c0_15 = arith.constant 0 : index
    %c0_16 = arith.constant 0 : index
    %21 = vector.load %arg7[%c0_15, %c0_16] : memref<1x128xf32, #tpu.memory_space<vmem>>, vector<1x128xf32>
    %22 = vector.broadcast %21 : vector<1x128xf32> to vector<16x128xf32>
    %23 = arith.addf %20, %22 : vector<16x128xf32>
    %cst_17 = arith.constant 0.000000e+00 : f32
    %24 = vector.broadcast %cst_17 : f32 to vector<16x128xf32>
    %25 = arith.maximumf %23, %24 : vector<16x128xf32>
    %26 = arith.truncf %25 : vector<16x128xf32> to vector<16x128xbf16>
    %c0_18 = arith.constant 0 : index
    %c0_19 = arith.constant 0 : index
    %c0_20 = arith.constant 0 : index
    %c0_21 = arith.constant 0 : index
    %27 = vector.load %arg8[%c0_18, %c0_19, %c0_20, %c0_21] : memref<2x1x16x128xbf16, #tpu.memory_space<vmem>>, vector<1x1x16x128xbf16>
    %28 = vector.shape_cast %27 : vector<1x1x16x128xbf16> to vector<16x128xbf16>
    %29 = vector.shape_cast %26 : vector<16x128xbf16> to vector<1x1x16x128xbf16>
    tpu.vector_store %arg8[%c0_18, %c0_19, %c0_20, %c0_21], %29 {strides = array<i32>} : memref<2x1x16x128xbf16, #tpu.memory_space<vmem>>, vector<1x1x16x128xbf16>,
    %c1 = arith.constant 1 : index
    %c0_22 = arith.constant 0 : index
    %c0_23 = arith.constant 0 : index
    %c0_24 = arith.constant 0 : index
    %30 = vector.load %arg2[%c1, %c0_22, %c0_23, %c0_24] : memref<2x1x18x16xbf16, #tpu.memory_space<vmem>>, vector<1x1x18x16xbf16>
    %31 = vector.shape_cast %30 : vector<1x1x18x16xbf16> to vector<18x16xbf16>
    %32 = vector.extract_strided_slice %31 {offsets = [0, 0], sizes = [16, 16], strides = [1, 1]} : vector<18x16xbf16> to vector<16x16xbf16>
    %33 = vector.extract_strided_slice %31 {offsets = [1, 0], sizes = [16, 16], strides = [1, 1]} : vector<18x16xbf16> to vector<16x16xbf16>
    %34 = vector.extract_strided_slice %31 {offsets = [2, 0], sizes = [16, 16], strides = [1, 1]} : vector<18x16xbf16> to vector<16x16xbf16>
    %c1_25 = arith.constant 1 : index
    %c0_26 = arith.constant 0 : index
    %c0_27 = arith.constant 0 : index
    %c0_28 = arith.constant 0 : index
    %35 = vector.load %arg3[%c1_25, %c0_26, %c0_27, %c0_28] : memref<2x1x18x16xbf16, #tpu.memory_space<vmem>>, vector<1x1x18x16xbf16>
    %36 = vector.shape_cast %35 : vector<1x1x18x16xbf16> to vector<18x16xbf16>
    %37 = vector.extract_strided_slice %36 {offsets = [0, 0], sizes = [16, 16], strides = [1, 1]} : vector<18x16xbf16> to vector<16x16xbf16>
    %38 = vector.extract_strided_slice %36 {offsets = [1, 0], sizes = [16, 16], strides = [1, 1]} : vector<18x16xbf16> to vector<16x16xbf16>
    %39 = vector.extract_strided_slice %36 {offsets = [2, 0], sizes = [16, 16], strides = [1, 1]} : vector<18x16xbf16> to vector<16x16xbf16>
    %c1_29 = arith.constant 1 : index
    %c0_30 = arith.constant 0 : index
    %c0_31 = arith.constant 0 : index
    %c0_32 = arith.constant 0 : index
    %40 = vector.load %arg4[%c1_29, %c0_30, %c0_31, %c0_32] : memref<2x1x18x16xbf16, #tpu.memory_space<vmem>>, vector<1x1x18x16xbf16>
    %41 = vector.shape_cast %40 : vector<1x1x18x16xbf16> to vector<18x16xbf16>
    %42 = vector.extract_strided_slice %41 {offsets = [0, 0], sizes = [16, 16], strides = [1, 1]} : vector<18x16xbf16> to vector<16x16xbf16>
    %43 = vector.extract_strided_slice %41 {offsets = [1, 0], sizes = [16, 16], strides = [1, 1]} : vector<18x16xbf16> to vector<16x16xbf16>
    %44 = vector.extract_strided_slice %41 {offsets = [2, 0], sizes = [16, 16], strides = [1, 1]} : vector<18x16xbf16> to vector<16x16xbf16>
    %45 = tpu.concatenate %32, %33, %34, %37, %38, %39, %42, %43, %44 in 1 : vector<16x16xbf16>, vector<16x16xbf16>, vector<16x16xbf16>, vector<16x16xbf16>, vector<16x16xbf16>, vector<16x16xbf16>, vector<16x16xbf16>, vector<16x16xbf16>, vector<16x16xbf16> -> vector<16x144xbf16>
    %c0_33 = arith.constant 0 : index
    %c0_34 = arith.constant 0 : index
    %46 = vector.load %arg5[%c0_33, %c0_34] : memref<144x128xbf16, #tpu.memory_space<vmem>>, vector<144x128xbf16>
    %cst_35 = arith.constant dense<0.000000e+00> : vector<16x128xf32>
    %47 = tpu.matmul %45, %46, %cst_35 {dimension_numbers = #tpu.dot_dimension_numbers<[1], [0], [0], [1], [0, 0, 1, 1], [], []>} : vector<16x144xbf16>, vector<144x128xbf16>, vector<16x128xf32> -> vector<16x128xf32>
    %c0_36 = arith.constant 0 : index
    %c0_37 = arith.constant 0 : index
    %48 = vector.load %arg6[%c0_36, %c0_37] : memref<1x128xf32, #tpu.memory_space<vmem>>, vector<1x128xf32>
    %49 = vector.broadcast %48 : vector<1x128xf32> to vector<16x128xf32>
    %50 = arith.mulf %47, %49 : vector<16x128xf32>
    %c0_38 = arith.constant 0 : index
    %c0_39 = arith.constant 0 : index
    %51 = vector.load %arg7[%c0_38, %c0_39] : memref<1x128xf32, #tpu.memory_space<vmem>>, vector<1x128xf32>
    %52 = vector.broadcast %51 : vector<1x128xf32> to vector<16x128xf32>
    %53 = arith.addf %50, %52 : vector<16x128xf32>
    %cst_40 = arith.constant 0.000000e+00 : f32
    %54 = vector.broadcast %cst_40 : f32 to vector<16x128xf32>
    %55 = arith.maximumf %53, %54 : vector<16x128xf32>
    %56 = arith.truncf %55 : vector<16x128xf32> to vector<16x128xbf16>
    %c1_41 = arith.constant 1 : index
    %c0_42 = arith.constant 0 : index
    %c0_43 = arith.constant 0 : index
    %c0_44 = arith.constant 0 : index
    %57 = vector.load %arg8[%c1_41, %c0_42, %c0_43, %c0_44] : memref<2x1x16x128xbf16, #tpu.memory_space<vmem>>, vector<1x1x16x128xbf16>
    %58 = vector.shape_cast %57 : vector<1x1x16x128xbf16> to vector<16x128xbf16>
    %59 = vector.shape_cast %56 : vector<16x128xbf16> to vector<1x1x16x128xbf16>
    tpu.vector_store %arg8[%c1_41, %c0_42, %c0_43, %c0_44], %59 {strides = array<i32>} : memref<2x1x16x128xbf16, #tpu.memory_space<vmem>>, vector<1x1x16x128xbf16>,
    return
  }
  func.func @transform_0(%arg0: i32, %arg1: i32) -> (i32, i32, i32, i32) {
    %c0_i32 = arith.constant 0 : i32
    %0 = arith.addi %arg1, %c0_i32 : i32
    %c0_i32_0 = arith.constant 0 : i32
    %c0_i32_1 = arith.constant 0 : i32
    %c0_i32_2 = arith.constant 0 : i32
    %c0_i32_3 = arith.constant 0 : i32
    return %c0_i32_0, %0, %c0_i32_1, %c0_i32_2 : i32, i32, i32, i32
  }
  func.func @transform_1(%arg0: i32, %arg1: i32) -> (i32, i32, i32, i32) {
    %c1_i32 = arith.constant 1 : i32
    %0 = arith.addi %arg1, %c1_i32 : i32
    %c0_i32 = arith.constant 0 : i32
    %c0_i32_0 = arith.constant 0 : i32
    %c0_i32_1 = arith.constant 0 : i32
    %c0_i32_2 = arith.constant 0 : i32
    return %c0_i32, %0, %c0_i32_0, %c0_i32_1 : i32, i32, i32, i32
  }
  func.func @transform_2(%arg0: i32, %arg1: i32) -> (i32, i32, i32, i32) {
    %c2_i32 = arith.constant 2 : i32
    %0 = arith.addi %arg1, %c2_i32 : i32
    %c0_i32 = arith.constant 0 : i32
    %c0_i32_0 = arith.constant 0 : i32
    %c0_i32_1 = arith.constant 0 : i32
    %c0_i32_2 = arith.constant 0 : i32
    return %c0_i32, %0, %c0_i32_0, %c0_i32_1 : i32, i32, i32, i32
  }
  func.func @transform_3(%arg0: i32, %arg1: i32) -> (i32, i32) {
    %c0_i32 = arith.constant 0 : i32
    %c0_i32_0 = arith.constant 0 : i32
    return %c0_i32, %arg0 : i32, i32
  }
  func.func @transform_4(%arg0: i32, %arg1: i32) -> (i32, i32) {
    %c0_i32 = arith.constant 0 : i32
    %c0_i32_0 = arith.constant 0 : i32
    return %c0_i32, %arg0 : i32, i32
  }
  func.func @transform_5(%arg0: i32, %arg1: i32) -> (i32, i32) {
    %c0_i32 = arith.constant 0 : i32
    %c0_i32_0 = arith.constant 0 : i32
    return %c0_i32, %arg0 : i32, i32
  }
  func.func @transform_6(%arg0: i32, %arg1: i32) -> (i32, i32, i32, i32) {
    %c0_i32 = arith.constant 0 : i32
    %c0_i32_0 = arith.constant 0 : i32
    %c0_i32_1 = arith.constant 0 : i32
    return %c0_i32, %arg1, %c0_i32_0, %arg0 : i32, i32, i32, i32
  }
}

</mosaic_0001>

<bundles_post_ra>
// kernel: tpu_custom_call.1
= control target key start
LH: loop header
LB: loop body
LE: loop exit
PB: predicated region body
PF: predicated region fallthrough
CT: control target
= control target key end

     0   :  { %s1990_s0 = inlined_call_operand.vmem [shape: bf16[2,18,18,16], index: 0, kind: input, shape index: {}]   ;;  %s1991_s1 = inlined_call_operand.vmem [shape: bf16[2,18,18,16], index: 1, kind: input, shape index: {}]   ;;  %s1992_s2 = inlined_call_operand.vmem [shape: bf16[2,18,18,16], index: 2, kind: input, shape index: {}]   ;;  %s1993_s3 = inlined_call_operand.vmem [shape: bf16[144,128], index: 3, kind: input, shape index: {}]   ;;  %s1994_s4 = inlined_call_operand.vmem [shape: f32[1,128], index: 4, kind: input, shape index: {}]   ;;  %s1995_s5 = inlined_call_operand.vmem [shape: f32[1,128], index: 5, kind: input, shape index: {}]   ;;  %s1996_s6 = inlined_call_operand.hbm [shape: bf16[2,16,16,128], index: 6, kind: output, shape index: {}]  }
   0x1   :  { %1998 = sst [smem:[#allocation11_spill]] %s1990_s0 }
   0x2   :  { %1999 = sst [smem:[#allocation12_spill]] %s1995_s5 }
   0x3   :  { %2000 = sst [smem:[#allocation13_spill]] %s1996_s6 }
   0x4   :  { %11 = vsyncpa [#allocation6], 0 }
   0x5   :  { %13 = vsyncpa [#allocation6 + $0x1], 0  ;;  %s1637_s21 = smov 0   ;;  %s1639_s22 = smov 0  }
   0x6   :  { %s1641_s23 = smov 0   ;;  %s1643_s24 = smov 0  }
   0x7   :  { %s1645_s25 = smov 0   ;;  %s1647_s26 = smov 0  }
   0x8   :  { %s1649_s27 = smov 0   ;;  %s1651_s28 = smov 0  }
   0x9   :  { %s1653_s29 = smov 0   ;;  %s1655_s30 = smov 0  }
   0xa LB: > { %2001 = sst [smem:[#allocation10_spill]] %s1578_s28  ;;  %s1214_s7 = sadd.s32 4294967295, %s1586_s30   ;;  %s1586_s30 = sphi %s1655_s30, %s19_s30   ;;  %s1582_s29 = sphi %s1653_s29, %s2019_s29   ;;  %s1578_s28 = sphi %s1651_s28, %s2018_s28   ;;  %s1574_s27 = sphi %s1649_s27, %s2017_s27   ;;  %s1570_s26 = sphi %s1647_s26, %s2016_s26   ;;  %s1566_s25 = sphi %s1645_s25, %s2015_s25   ;;  %s1562_s24 = sphi %s1643_s24, %s2014_s24   ;;  %s1558_s23 = sphi %s1641_s23, %s2013_s23   ;;  %s1554_s22 = sphi %s1639_s22, %s2012_s22   ;;  %s1550_s21 = sphi %s1637_s21, %s2011_s21  }
   0xb   : > { %s1215_s8 = sadd.s32 4294967294, %s1586_s30   ;;  %s28_s9 = sadd.s32 1, %s1582_s29 }
   0xc   : > { %s38_s10 = sadd.s32 1, %s1574_s27  ;;  %p29_p0 = scmp.ge.s32.totalorder %s28_s9, 16 }
   0xd   : > { %p45_p1 = scmp.ne.s32.totalorder %s1574_s27, %s1570_s26  ;;  %p46_p2 = scmp.eq.s32.totalorder %s1586_s30, 0 }
   0xe   : > { %s66_s11 = sadd.s32 1, %s1566_s25  ;;  %p73_p4 = scmp.ne.s32.totalorder %s1566_s25, %s1562_s24 }
   0xf   : > { %s1695_s12 = scalar_select %p29_p0, 0, %s28_s9  }
  0x10   : > { %p1702_p3 = por %p46_p2, %p45_p1  ;;  %p1713_p7 = por %p73_p4, %p46_p2 }
  0x11   : > { %s35_s14 = ssub.s32 %s1582_s29, %s1695_s12  ;;  %s62_s15 = sadd.s32 1, %s1695_s12 }
  0x12   : > { %p36_p5 = scmp.eq.s32.totalorder %s35_s14, 0  ;;  %s63_s16 = ssub.s32 %s28_s9, %s62_s15 }
  0x13   : > { %p64_p6 = scmp.eq.s32.totalorder %s63_s16, 0  ;;  %s89_s20 = sadd.s32 2, %s1582_s29 }
  0x14   : > { %s1718_s18 = scalar_select %p36_p5, %s1574_s27, %s38_s10  }
  0x15   : > { %s1721_s19 = scalar_select %p64_p6, %s1566_s25, %s66_s11  }
  0x16   : > { %s90_s6 = sadd.s32 2, %s1695_s12  ;;  %s94_s5 = sadd.s32 1, %s1558_s23 }
  0x17   : > { %s91_s28 = ssub.s32 %s89_s20, %s90_s6  ;;  %p101_p9 = scmp.ne.s32.totalorder %s1558_s23, %s1554_s22 }
  0x18   : > { %p92_p8 = scmp.eq.s32.totalorder %s91_s28, 0  ;;  %p211_p10 = scmp.eq.s32.totalorder %s1214_s7, 15 }
  0x19   : > { %p216_p11 = scmp.ne.s32.totalorder %s1570_s26, %s1550_s21  ;;  %p1735_p12 = por %p101_p9, %p46_p2 }
  0x1a   : > { %s1731_s14 = scalar_select %p92_p8, %s1558_s23, %s94_s5  }
  0x1b   : > { %p1742_p13 = por %p211_p10, %p45_p1  ;;  %p217_p0 = scmp.eq.s32.totalorder %s1215_s8, 15 }
  0x1c   : > { %p1220_p5 = scmp.ge.s32.totalorder %s1586_s30, 16 }
  0x1d   : > { %p1746_p4 = por %p217_p0, %p216_p11 }
  0x1e   : > { %252 = sbr.rel (%p1220_p5) target bundleno = 66 (0x42), region = 28 }
  0x23   : > { %255 = sbr.rel (!%p1702_p3) target bundleno = 48 (0x30), region = 32  ;;  %s257_s5 = sand.u32 (%p1702_p3), 1, %s1574_s27  }
  0x24   : > { %s1387_s28 = smul.u32 (%p1702_p3), 12, %s1582_s29  ;;  %s2007_s0 = sld [smem:[#allocation11_spill]] (%p1702_p3) }
  0x25   : > { %s1386_s7 = smul.u32 (%p1702_p3), 24, %s257_s5 }
  0x27   : > { %s259_s8 = scalar_lea.vmem (%p1702_p3), [#allocation2], %s1386_s7 }
  0x2a   : > { %s262_s16 = scalar_lea.vmem %s2007_s0, %s1387_s28 }
  0x2b   : > { %v279_v0 = vld [vmem:[%s262_s16] sm:$0xff]   ;;  %v283_v1 = vld [vmem:[%s262_s16 + $0x8] sm:$0xf]  ;;  %v285_v2 = vld [vmem:[%s262_s16 + $0xd8] sm:$0xff]  }
  0x2c   : > { %280 = vst [vmem:[%s259_s8] sm:$0xff] %v279_v0   ;;  %v289_v3 = vld [vmem:[%s262_s16 + $0xe0] sm:$0xf] }
  0x2d   : > { %284 = vst [vmem:[%s259_s8 + $0x8] sm:$0xf] %v283_v1 }
  0x2e   : > { %286 = vst [vmem:[%s259_s8 + $0xc] sm:$0xff] %v285_v2  }
  0x2f   : > { %290 = vst [vmem:[%s259_s8 + $0x14] sm:$0xf] %v289_v3 }
  0x30 PF: > { %326 = sbr.rel (!%p1713_p7) target bundleno = 57 (0x39), region = 73  ;;  %s328_s13 = sand.u32 (%p1713_p7), 1, %s1566_s25  }
  0x31   : > { %s1093_s20 = smul.u32 (%p1713_p7), 12, %s1582_s29 }
  0x32   : > { %s1388_s5 = smul.u32 (%p1713_p7), 24, %s328_s13 }
  0x33   : > { %s1094_s15 = scalar_lea.vmem (%p1713_p7), %s1991_s1, %s1093_s20 }
  0x34   : > { %v1222_v4 = vld [vmem:[%s1094_s15 + $0xc] sm:$0xff] (%p1713_p7)   ;;  %v1224_v5 = vld [vmem:[%s1094_s15 + $0x14] sm:$0xf] (%p1713_p7)  ;;  %v1225_v6 = vld [vmem:[%s1094_s15 + $0xe4] sm:$0xff] (%p1713_p7)   ;;  %s330_s7 = scalar_lea.vmem (%p1713_p7), [#allocation3], %s1388_s5 }
  0x35   : > { %352 = vst [vmem:[%s330_s7] sm:$0xff] %v1222_v4   ;;  %v1227_v7 = vld [vmem:[%s1094_s15 + $0xec] sm:$0xf] }
  0x36   : > { %356 = vst [vmem:[%s330_s7 + $0x8] sm:$0xf] %v1224_v5 }
  0x37   : > { %358 = vst [vmem:[%s330_s7 + $0xc] sm:$0xff] %v1225_v6  }
  0x38   : > { %362 = vst [vmem:[%s330_s7 + $0x14] sm:$0xf] %v1227_v7 }
  0x39 PF: > { %398 = sbr.rel (!%p1735_p12) target bundleno = 66 (0x42), region = 114  ;;  %s400_s17 = sand.u32 (%p1735_p12), 1, %s1558_s23  }
  0x3a   : > { %s1098_s16 = smul.u32 (%p1735_p12), 12, %s1582_s29 }
  0x3b   : > { %s1389_s8 = smul.u32 (%p1735_p12), 24, %s400_s17 }
  0x3c   : > { %s1099_s11 = scalar_lea.vmem (%p1735_p12), %s1992_s2, %s1098_s16 }
  0x3d   : > { %v1228_v8 = vld [vmem:[%s1099_s11 + $0x18] sm:$0xff] (%p1735_p12)   ;;  %v1230_v9 = vld [vmem:[%s1099_s11 + $0x20] sm:$0xf] (%p1735_p12)  ;;  %v1231_v10 = vld [vmem:[%s1099_s11 + $0xf0] sm:$0xff] (%p1735_p12)   ;;  %s402_s5 = scalar_lea.vmem (%p1735_p12), [#allocation4], %s1389_s8 }
  0x3e   : > { %424 = vst [vmem:[%s402_s5] sm:$0xff] %v1228_v8   ;;  %v1233_v11 = vld [vmem:[%s1099_s11 + $0xf8] sm:$0xf] }
  0x3f   : > { %428 = vst [vmem:[%s402_s5 + $0x8] sm:$0xf] %v1230_v9 }
  0x40   : > { %430 = vst [vmem:[%s402_s5 + $0xc] sm:$0xff] %v1231_v10  }
  0x41   : > { %434 = vst [vmem:[%s402_s5 + $0x14] sm:$0xf] %v1233_v11 }
  0x42 PF: > { %p1234_p1 = scmp.ge.s32.totalorder %s1586_s30, 1  ;;  %p469_p2 = scmp.lt.s32.totalorder %s1586_s30, 17 }
  0x44   : > { %p470_p3 = pnand %p1234_p1, %p469_p2 }
  0x45   : > { %s483_s9 = sand.u32 (!%p470_p3), 1, %s1562_s24   ;;  %s1776_s15 = sand.u32 (!%p470_p3), 1, %s1570_s26  }
  0x46   : > { %473 = sbr.rel (%p470_p3) target bundleno = 389 (0x185), region = 155  ;;  %s490_s8 = sand.u32 (!%p470_p3), 1, %s1554_s22  }
  0x47   : > { %s1391_s28 = smul.u32 (!%p470_p3), 24, %s483_s9  ;;  %s1588_s24 = smov (!%p470_p3), 48  }
  0x48   : > { %s1390_s7 = smul.u32 (!%p470_p3), 24, %s1776_s15  ;;  %s1589_s20 = smov (!%p470_p3), 96  }
  0x49   : > { %s1779_s17 = scalar_lea.vmem (!%p470_p3), [#allocation3], %s1391_s28  ;;  %s1392_s13 = smul.u32 (!%p470_p3), 24, %s490_s8 }
  0x4a   : > { %s478_s16 = scalar_lea.vmem (!%p470_p3), [#allocation2], %s1390_s7  ;;  %s1590_s11 = smov (!%p470_p3), 32  }
  0x4b   : > { %v1782_v12 = vld [vmem:[%s1779_s17 + $0xc] sm:$0xff]  ;;  %v1290_v13 = vld [vmem:[%s1779_s17 + $0x14] sm:$0x1]  ;;  %v1785_v14 = vld [vmem:[%s478_s16 + $0xc] sm:$0xff]  ;;  %vm582_vm0 = vcmask 1046528   ;;  %s1798_s22 = scalar_lea.vmem [#allocation4], %s1392_s13 }
  0x4c   : > { %v1287_v15 = vld [vmem:[%s478_s16 + $0x14] sm:$0x1]  ;;  %v834_v16 = vunpack.c.l.b16 %v1290_v13  ;;  %831 = vrot.lane.b32.xlu1 %v1782_v12, %s1588_s24  ;;  %v837_v18 = vshrl.u32 %v1782_v12, 16  ;;  %v839_v19 = vshll.u32 %v1782_v12, 16  ;;  %v552_v20 = vld [vmem:[%s478_s16 + $0x8] sm:$0x1] }
  0x4d   : > { %v805_v17 = vunpack.c.l.b16 %v1287_v15  ;;  %vm567_vm1 = vsmask.f32 7424  ;;  %v810_v22 = vshll.u32 %v1785_v14, 16  ;;  %v1793_v23 = vld [vmem:[%s478_s16] sm:$0xff]  ;;  %v821_v25 = vrot.slane %v1785_v14, 1  ;;  %v1801_v31 = vld [vmem:[%s1798_s22 + $0xc] sm:$0xff] }
  0x4e   : > { %v835_v21 = vpack.c.b16 %v834_v16, %v834_v16  ;;  %v841_v26 = vrot.slane %v839_v19, 1  ;;  %v555_v27 = vld [vmem:[%s1779_s17 + $0x8] sm:$0x1]  ;;  %v808_v29 = vshrl.u32 %v1785_v14, 16  ;;  %v1293_v32 = vld [vmem:[%s1798_s22 + $0x14] sm:$0x1]  ;;  %v565_v33 = vunpack.c.l.b16 %v552_v20  ;;  %860 = vrot.lane.b32.xlu2 %v1801_v31, %s1589_s20 }
  0x4f   : > { %v806_v24 = vpack.c.b16 %v805_v17, %v805_v17  ;;  %v812_v30 = vrot.slane %v810_v22, 1  ;;  %v863_v37 = vunpack.c.l.b16 %v1293_v32  ;;  %v866_v39 = vshrl.u32 %v1801_v31, 16  ;;  %v1807_v41 = vld [vmem:[%s1779_s17] sm:$0xff]  ;;  %v1372_v48 = vld [vmem:[%s1993_s3 + $0x38] sm:$0xff]  ;;  %s1591_s28 = smov 64   ;;  %s1592_s16 = smov 80  }
  0x50   : > { %v844_v28 = vshll.u32 %v835_v21, 16  ;;  %v842_v35 = vor.u32 %v841_v26, %v837_v18  ;;  %v868_v40 = vshll.u32 %v1801_v31, 16  ;;  %v596_v42 = vunpack.c.l.b16 %v555_v27  ;;  %972 = vmatpush.bf16.msra.mxu2 %v1372_v48  ;;  %v1371_v56 = vld [vmem:[%s1993_s3 + $0x30] sm:$0xff]  ;;  %v558_v60 = vld [vmem:[%s1798_s22 + $0x8] sm:$0x1]  ;;  %v1834_v6 = vld [vmem:[%s1798_s22] sm:$0xff] }
  0x51   : > { %v822_v34 = vrot.slane %v806_v24, 1  ;;  %v815_v36 = vshll.u32 %v806_v24, 16  ;;  %v1812_v44 = vpack.c.b16 %v863_v37, %v863_v37  ;;  %v571_v47 = vshll.u32 %v1793_v23, 16  ;;  %v1370_v8 = vld [vmem:[%s1993_s3 + $0x28] sm:$0xff]  ;;  %s1593_s5 = smov 16   ;;  %s1594_s9 = smov 112  }
  0x52   : > { %v846_v38 = vrot.slane %v844_v28, 1  ;;  %v870_v46 = vrot.slane %v868_v40, 1  ;;  %v813_v49 = vor.u32 %v812_v30, %v808_v29  ;;  %v566_v52 = vpack.c.b16 %v565_v33, %v565_v33  ;;  %v1369_v18 = vld [vmem:[%s1993_s3 + $0x20] sm:$0xff]  ;;  %v1368_v33 = vld [vmem:[%s1993_s3 + $0x18] sm:$0xff]  ;;  %v1366_v37 = vld [vmem:[%s1993_s3 + $0x8] sm:$0xff]  ;;  %s1020_s8 = scalar_lea.sflag [#allocation6], %s1776_s15 }
  0x53   : > { %v823_v43 = vsel %vm582_vm0, %v821_v25, %v822_v34  ;;  %v817_v50 = vrot.slane %v815_v36, 1  ;;  %v873_v51 = vshll.u32 %v1812_v44, 16  ;;  %v597_v54 = vpack.c.b16 %v596_v42, %v596_v42  ;;  %v1360_v34 = vld [vmem:[%s1993_s3 + $0x38] sm:$0xff]  ;;  %v1359_v36 = vld [vmem:[%s1993_s3 + $0x30] sm:$0xff]  ;;  %v1373_v40 = vld [vmem:[%s1993_s3 + $0x40] sm:$0xff] }
  0x54   : > { %824 = vrot.lane.b32.xlu0 %v823_v43, %s1590_s11  ;;  %v847_v45 = vsel %vm567_vm1, %v842_v35, %v846_v38  ;;  %v871_v53 = vor.u32 %v870_v46, %v866_v39  ;;  %v601_v55 = vshll.u32 %v1807_v41, 16  ;;  %v850_v58 = vrot.slane %v1782_v12, 1  ;;  %973 = vmatpush.bf16.msra.mxu2 %v1371_v56  ;;  %v1367_v35 = vld [vmem:[%s1993_s3 + $0x10] sm:$0xff]  ;;  %v1358_v38 = vld [vmem:[%s1993_s3 + $0x28] sm:$0xff]  ;;  %v1365_v39 = vld [vmem:[%s1993_s3] sm:$0xff] }
  0x55   : > { %848 = vrot.lane.b32.xlu1 %v847_v45, %s1591_s28  ;;  %v875_v57 = vrot.slane %v873_v51, 1  ;;  %v851_v59 = vrot.slane %v835_v21, 1  ;;  %v569_v61 = vshrl.u32 %v1793_v23, 16  ;;  %v573_v62 = vrot.slane %v571_v47, 1  ;;  %741 = vmatpush.bf16.msra.mxu0 %v1360_v34  ;;  %v1356_v46 = vld [vmem:[%s1993_s3 + $0x18] sm:$0xff]  ;;  %v1361_v47 = vld [vmem:[%s1993_s3 + $0x40] sm:$0xff] }
  0x56   : > { %v818_v63 = vsel %vm567_vm1, %v813_v49, %v817_v50  ;;  %v576_v0 = vshll.u32 %v566_v52, 16  ;;  %v599_v1 = vshrl.u32 %v1807_v41, 16  ;;  %v603_v4 = vrot.slane %v601_v55, 1  ;;  %993 = vmatpush.bf16.msra.mxu3 %v1373_v40  ;;  %762 = vmatpush.bf16.msra.mxu1 %v1361_v47  ;;  %v1354_v51 = vld [vmem:[%s1993_s3 + $0x8] sm:$0xff]  ;;  %v1502_v34 = vld [vmem:[%s1994_s4] ss:$0 sm:$0xff] }
  0x57   : > { %v852_v2 = vsel %vm582_vm0, %v850_v58, %v851_v59  ;;  %v876_v3 = vsel %vm567_vm1, %v871_v53, %v875_v57  ;;  %v606_v5 = vshll.u32 %v597_v54, 16  ;;  %v625_v7 = vunpack.c.l.b16 %v558_v60 }
  0x58   : > { %853 = vrot.lane.b32.xlu2 %v852_v2, %s1592_s16  ;;  %v583_v9 = vrot.slane %v1793_v23, 1  ;;  %v584_v10 = vrot.slane %v566_v52, 1  ;;  %v574_v11 = vor.u32 %v573_v62, %v569_v61  ;;  %v578_v12 = vrot.slane %v576_v0, 1  ;;  %974 = vmatpush.bf16.msra.mxu2 %v1370_v8  ;;  %v1353_v52 = vld [vmem:[%s1993_s3] sm:$0xff] }
  0x59   : > { %v604_v13 = vor.u32 %v603_v4, %v599_v1  ;;  %v608_v15 = vrot.slane %v606_v5, 1  ;;  %v626_v16 = vpack.c.b16 %v625_v7, %v625_v7  ;;  %v630_v17 = vshll.u32 %v1834_v6, 16  ;;  %742 = vmatpush.bf16.msra.mxu0 %v1359_v36 }
  0x5a   : > { %v585_v19 = vsel %vm582_vm0, %v583_v9, %v584_v10  ;;  %v579_v20 = vsel %vm567_vm1, %v574_v11, %v578_v12  ;;  %v628_v22 = vshrl.u32 %v1834_v6, 16  ;;  %v612_v26 = vrot.slane %v1807_v41, 1 }
  0x5b   : > { %v609_v21 = vsel %vm567_vm1, %v604_v13, %v608_v15  ;;  %v632_v24 = vrot.slane %v630_v17, 1  ;;  %v635_v25 = vshll.u32 %v626_v16, 16  ;;  %v613_v27 = vrot.slane %v597_v54, 1 }
  0x5c   : > { %819 = vrot.lane.b32.xlu0 %v818_v63, %s1593_s5  ;;  %975 = vmatpush.bf16.msra.mxu2 %v1369_v18  ;;  %v879_v42 = vrot.slane %v1801_v31, 1  ;;  %v880_v43 = vrot.slane %v1812_v44, 1  ;;  %vm644_vm2 = vcmask 130048   ;;  %v1355_v31 = vld [vmem:[%s1993_s3 + $0x10] sm:$0xff]  ;;  %v641_v44 = vrot.slane %v1834_v6, 1 }
  0x5d   : > { %877 = vrot.lane.b32.xlu1 %v876_v3, %s1594_s9  ;;  %v633_v28 = vor.u32 %v632_v24, %v628_v22  ;;  %v637_v29 = vrot.slane %v635_v25, 1  ;;  %v614_v30 = vsel %vm582_vm0, %v612_v26, %v613_v27  ;;  %743 = vmatpush.bf16.msra.mxu0 %v1358_v38  ;;  %v642_v48 = vrot.slane %v626_v16, 1  ;;  %v1500_v18 = vld [vmem:[%s1994_s4] ss:$0 sm:$0xff] }
  0x5e   : > { %v881_v45 = vsel %vm582_vm0, %v879_v42, %v880_v43  ;;  %vm647_vm3 = vcmask 261120   ;;  %vm650_vm4 = vcmask 392192   ;;  %vm653_vm5 = vcmask 523264  }
  0x5f   : > { %v638_v32 = vsel %vm567_vm1, %v633_v28, %v637_v29  ;;  %1342 = vmatmul.msk.bf16.vlgmr.msra.gmra.mxu3 %vm644_vm2, %v881_v45  ;;  %v643_v50 = vsel %vm582_vm0, %v641_v44, %v642_v48  ;;  %vm656_vm6 = vcmask 654336   ;;  %vm659_vm7 = vcmask 785408  }
  0x60   : > { %586 = vrot.lane.b32.xlu2 %v585_v19, %s1590_s11  ;;  %976 = vmatpush.bf16.msra.mxu2 %v1368_v33  ;;  %vm662_vm8 = vcmask 916480  }
  0x61   : > { %1284 = vmatmul.msk.bf16.vlgmr.msra.gmra.mxu1 %vm644_vm2, %v643_v50 }
  0x64   : > { %580 = vrot.lane.b32.xlu0 %v579_v20, %s1593_s5  ;;  %977 = vmatpush.bf16.msra.mxu2 %v1367_v35 }
  0x65   : > { %610 = vrot.lane.b32.xlu1 %v609_v21, %s1591_s28 }
  0x68   : > { %615 = vrot.lane.b32.xlu2 %v614_v30, %s1592_s16  ;;  %978 = vmatpush.bf16.msra.mxu2 %v1366_v37 }
  0x6c   : > { %593 = vrot.lane.b32.xlu0 %v1807_v41, %s1588_s24  ;;  %979 = vmatpush.bf16.msra.mxu2 %v1365_v39  ;;  %v1357_v41 = vld [vmem:[%s1993_s3 + $0x20] sm:$0xff] }
  0x6d   : > { %639 = vrot.lane.b32.xlu1 %v638_v32, %s1594_s9  ;;  %744 = vmatpush.bf16.msra.mxu0 %v1357_v41  ;;  %s1235_s9 = sshll.u32 %s1776_s15, 4 }
  0x6e   : > { %s536_s11 = scalar_lea.vmem [#allocation5], %s1235_s9 }
  0x71   : > { %745 = vmatpush.bf16.msra.mxu0 %v1356_v46 }
  0x74   : > { %622 = vrot.lane.b32.xlu0 %v1834_v6, %s1589_s20  ;;  %s2008_s20 = sld [smem:[#allocation12_spill]] }
  0x75   : > { %746 = vmatpush.bf16.msra.mxu0 %v1355_v31 }
  0x79   : > { %747 = vmatpush.bf16.msra.mxu0 %v1354_v51 }
  0x7a   : > { %v1501_v21 = vld [vmem:[%s2008_s20] ss:$0 sm:$0xff] }
  0x7b   : > { %v1503_v37 = vld [vmem:[%s2008_s20] ss:$0 sm:$0xff] }
  0x7d   : > { %748 = vmatpush.bf16.msra.mxu0 %v1353_v52 }
  0xa8   : > { %v861_v53 = vpop.permute.xlu2 %860 }
  0xb2   : > { %v854_v58 = vpop.permute.xlu2 %853 }
  0xba   : > { %v587_v2 = vpop.permute.xlu2 %586 }
  0xbe   : > { %v832_v49 = vpop.permute.xlu1 %831 }
  0xc2   : > { %v616_v9 = vpop.permute.xlu2 %615 }
  0xc6   : > { %v825_v54 = vpop.permute.xlu0 %824 }
  0xc7   : > { %v849_v55 = vpop.permute.xlu1 %848 }
  0xce   : > { %v820_v56 = vpop.permute.xlu0 %819 }
  0xcf   : > { %v883_v57 = vsel %vm644_vm2, %v1785_v14, %v820_v56  ;;  %v878_v62 = vpop.permute.xlu1 %877 }
  0xd0   : > { %v885_v59 = vsel %vm647_vm3, %v883_v57, %v825_v54 }
  0xd1   : > { %v887_v60 = vsel %vm650_vm4, %v885_v59, %v832_v49 }
  0xd2   : > { %v889_v61 = vsel %vm653_vm5, %v887_v60, %v849_v55 }
  0xd3   : > { %v891_v63 = vsel %vm656_vm6, %v889_v61, %v854_v58 }
  0xd4   : > { %v893_v0 = vsel %vm659_vm7, %v891_v63, %v861_v53 }
  0xd5   : > { %v895_v1 = vsel %vm662_vm8, %v893_v0, %v878_v62 }
  0xd6   : > { %980 = vmatmul.bf16.vlgmr.msra.gmra.mxu2 %v895_v1  ;;  %v581_v14 = vpop.permute.xlu0 %580 }
  0xd7   : > { %v611_v3 = vpop.permute.xlu1 %610  ;;  %v646_v4 = vsel %vm644_vm2, %v1793_v23, %v581_v14 }
  0xd8   : > { %v649_v6 = vsel %vm647_vm3, %v646_v4, %v587_v2 }
  0xde   : > { %v594_v5 = vpop.permute.xlu0 %593  ;;  %v764_v26 = vpop.f32.mrf.mxu1 }
  0xdf   : > { %v652_v7 = vsel %vm650_vm4, %v649_v6, %v594_v5  ;;  %v640_v10 = vpop.permute.xlu1 %639 }
  0xe0   : > { %v655_v8 = vsel %vm653_vm5, %v652_v7, %v611_v3 }
  0xe1   : > { %v658_v11 = vsel %vm656_vm6, %v655_v8, %v616_v9 }
  0xe2   : > { %v995_v16 = vpop.f32.mrf.mxu3 }
  0xe6   : > { %v623_v12 = vpop.permute.xlu0 %622  ;;  %v766_v38 = vpop.f32.mrf.mxu1 }
  0xe7   : > { %v661_v13 = vsel %vm659_vm7, %v658_v11, %v623_v12 }
  0xe8   : > { %v664_v15 = vsel %vm662_vm8, %v661_v13, %v640_v10 }
  0xe9   : > { %749 = vmatmul.bf16.vlgmr.msra.gmra.mxu0 %v664_v15 }
  0xea   : > { %v997_v19 = vpop.f32.mrf.mxu3 }
 0x159   : > { %v981_v23 = vpop.f32.mrf.mxu2 }
 0x15a   : > { %v996_v17 = vadd.f32 %v995_v16, %v981_v23 }
 0x15c   : > { %v1004_v20 = vmul.f32 %v1500_v18, %v996_v17 }
 0x15e   : > { %v1010_v25 = vadd.f32 %v1501_v21, %v1004_v20 }
 0x160   : > { %v1012_v30 = vmax.f32 %v1010_v25, 0.0 }
 0x161   : > { %v983_v22 = vpop.f32.mrf.mxu2 }
 0x162   : > { %v998_v24 = vadd.f32 %v997_v19, %v983_v22 }
 0x164   : > { %v1005_v27 = vmul.f32 %v1500_v18, %v998_v24 }
 0x166   : > { %v1011_v28 = vadd.f32 %v1501_v21, %v1005_v27  ;;  %v750_v29 = vpop.f32.mrf.mxu0 }
 0x167   : > { %v765_v33 = vadd.f32 %v764_v26, %v750_v29 }
 0x168   : > { %v1013_v32 = vmax.f32 %v1011_v28, 0.0 }
 0x169   : > { %v773_v36 = vmul.f32 %v1502_v34, %v765_v33 }
 0x16a   : > { %v1383_v35 = vpack.c.bf16 %v1013_v32, %v1012_v30 }
 0x16b   : > { %v779_v41 = vadd.f32 %v1503_v37, %v773_v36 }
 0x16c   : > { %1385 = vst [vmem:[%s536_s11 + $0x8] sm:$0xff] %v1383_v35  }
 0x16d   : > { %v781_v45 = vmax.f32 %v779_v41, 0.0 }
 0x16e   : > { %v752_v39 = vpop.f32.mrf.mxu0 }
 0x16f   : > { %v767_v40 = vadd.f32 %v766_v38, %v752_v39 }
 0x171   : > { %v774_v42 = vmul.f32 %v1502_v34, %v767_v40 }
 0x173   : > { %v780_v43 = vadd.f32 %v1503_v37, %v774_v42 }
 0x175   : > { %v782_v46 = vmax.f32 %v780_v43, 0.0 }
 0x177   : > { %v1378_v47 = vpack.c.bf16 %v782_v46, %v781_v45 }
 0x179   : > { %1379 = vst [vmem:[%s536_s11] sm:$0xff] %v1378_v47  }
 0x17a   : > { %s2009_s13 = sld [smem:[#allocation10_spill]]  ;;  %s1043_s16 = sshll.u32 %s536_s11, 4  ;;  %s1044_s16 = int_to_ptr.vmem [resolvable:$true] %s1043_s16 }
 0x17b   : > { %s2010_s22 = sld [smem:[#allocation13_spill]]  ;;  %s1595_s28 = smov 128  }
 0x17c   : > { %1393 = sst [smem:[#allocation8]] (%p1742_p13), %s1595_s28  ;;  %s1596_s15 = smov 2048  }
 0x17d   : > { %1394 = sst [smem:[#allocation8 + $0x1]] (%p1742_p13), %s1596_s15  ;;  %s1597_s0 = smov 2  }
 0x17e   : > { %1395 = sst [smem:[#allocation8 + $0x2]] (%p1742_p13), %s1597_s0  ;;  %s1599_s11 = smov 4  }
 0x17f   : > { %1398 = sst [smem:[#allocation8 + $0x5]] (%p1742_p13), %s1599_s11  ;;  %s1601_s24 = smov 0  }
 0x180   : > { %s1374_s5 = sshll.u32 %s2009_s13, 3  ;;  %s1598_s13 = smov 64  }
 0x181   : > { %s1032_s7 = scalar_lea.hbm %s2010_s22, %s1374_s5  ;;  %1396 = sst [smem:[#allocation8 + $0x3]] (%p1742_p13), %s1598_s13 }
 0x182   : > { %s1045_s17 = sshll.u32 %s1032_s7, 4  ;;  %1397 = sst [smem:[#allocation8 + $0x4]] (%p1742_p13), %s1598_s13  ;;  %s1046_s17 = int_to_ptr.hbm [resolvable:$true] %s1045_s17 }
 0x183   : > { %s1600_s5 = smov [#allocation7]  }
 0x184   : > { %1399 = dma.general (%p1742_p13), %s1044_s16, 256, %s1046_s17, %s1020_s8, %s1600_s5, [#allocation8], %s1601_s24, 0  }
 0x185 PF: > { %p1405_p6 = scmp.ge.s32.totalorder %s1586_s30, 2  ;;  %s1073_s9 = sand.u32 1, %s1550_s21  }
 0x186   : > { %s1074_s0 = scalar_lea.sflag [#allocation6], %s1073_s9 }
 0x187   : > { %p1402_p7 = pnand %p1405_p6, %p1746_p4 }
 0x189   : > { %p1403_p8 = pneg %p1402_p7 }
 0x18b   : > { %1545 = dma.done.wait (%p1403_p8), %s1074_s0, 256  }
 0x18c   : > { %1547 = vsyncadd (%p1403_p8), %s1074_s0, 4294967040  ;;  %s19_s30 = sadd.s32 1, %s1586_s30   ;;  %s2011_s21 = smov %s1570_s26 }
 0x18d   : > { %p16_p9 = scmp.ge.s32.totalorder %s19_s30, 18   ;;  %s2012_s22 = smov %s1558_s23 }
 0x18e   : > { %s2013_s23 = smov %s1731_s14  ;;  %s2014_s24 = smov %s1566_s25 }
 0x18f   : > { %s2015_s25 = smov %s1721_s19  ;;  %s2016_s26 = smov %s1574_s27 }
 0x190   : > { %s2017_s27 = smov %s1718_s18  ;;  %s2018_s28 = smov %s1582_s29 }
 0x191   : > { %s2019_s29 = smov %s1695_s12  ;;  %18 = sbr.rel (!%p16_p9) target bundleno = 10 (0xa), region = 241 }
 0x196   :  { %1080 = vsyncpa [#allocation6], 1 }
 0x197   :  { %1082 = vsyncpa [#allocation6 + $0x1], 1 }

</bundles_post_ra>
